<compile_context>
chip_gen: v7x
topology: tpu7x:2x2x1
jax: 0.10.0
libtpu: 0.0.40
codegen_flags: <defaults>
</compile_context>

<pallas_src>
import functools

import jax
import jax.numpy as jnp
from jax.experimental import pallas as pl
from jax.experimental.pallas import tpu as pltpu

_LANES = 128
# Finite "minus infinity": exp(_MASK - m) underflows to exactly 0 for any
# realistic running max m, and never produces inf-inf = NaN.
_MASK = -1e30


def _round_up(x, m):
    return ((x + m - 1) // m) * m


def _row_align(*dtypes):
    """Sublane packing granularity: 8 rows (4B), 16 rows (2B), 32 rows (1B)."""
    itemsize = min(jnp.dtype(d).itemsize for d in dtypes)
    return max(8, 32 // itemsize)


def _densecl_head_kernel(pos_ref, neg_ref, out_ref, m_sc, s_sc, *,
                         inv_temperature, tile_n, tile_k, real_k, need_k_mask):
    """Streaming online-logsumexp over K tiles for one N tile.

    pos_ref: (tile_n, 1)       positive similarity (native dtype)
    neg_ref: (tile_n, tile_k)  negative similarities (native dtype)
    out_ref: (tile_n, 1)       per-row CE loss (f32), written at the last K tile
    m_sc:    (tile_n, 128)     per-LANE running max (f32, lane dense)
    s_sc:    (tile_n, 128)     per-LANE running exp-sum (f32, lane dense)
    """
    j = pl.program_id(1)
    num_chunks = tile_k // _LANES

    # Positive logit (constant across the K sweep); finite for every real row.
    p = pos_ref[...].astype(jnp.float32) * inv_temperature          # (tile_n, 1)

    @pl.when(j == 0)
    def _init():
        # Seed the per-lane running max with the positive logit: the rescale
        # exp(m_old - m_new) never sees -inf, and lanes that only ever see
        # masked columns contribute exactly 0 to the sum.
        m_sc[...] = jnp.broadcast_to(p, (tile_n, _LANES))
        s_sc[...] = jnp.zeros_like(s_sc)

    if need_k_mask:
        # Global column index of lane l in chunk 0 of this K tile.
        col0 = (jax.lax.broadcasted_iota(jnp.int32, (tile_n, _LANES), 1)
                + j * tile_k)

    def load_chunk(c):
        """(tile_n, 128) f32 scaled (and K-masked) chunk c of this K tile."""
        x = neg_ref[:, c * _LANES:(c + 1) * _LANES].astype(jnp.float32)
        x = x * inv_temperature
        if need_k_mask:
            x = jnp.where(col0 + (c * _LANES) < real_k, x, _MASK)
        return x

    # ---- Pass 1: per-lane max over this K tile (pure VPU max folds). ----
    tile_max = load_chunk(0)
    for c in range(1, num_chunks):
        tile_max = jnp.maximum(tile_max, load_chunk(c))

    m_old = m_sc[...]                                               # (tile_n, 128)
    m_new = jnp.maximum(m_old, tile_max)
    alpha = jnp.exp(m_old - m_new)            # per-lane rescale, (tile_n, 128)

    # ---- Pass 2: exp + lane-dense accumulation (VPU + EUP, no XLU). ----
    partial = jnp.exp(load_chunk(0) - m_new)
    for c in range(1, num_chunks):
        partial = partial + jnp.exp(load_chunk(c) - m_new)

    s_sc[...] = s_sc[...] * alpha + partial
    m_sc[...] = m_new

    @pl.when(j == pl.num_programs(1) - 1)
    def _finalize():
        # One cross-lane (XLU) max + sum per row, once per N tile.
        m_lane = m_sc[...]
        m_row = jnp.max(m_lane, axis=-1, keepdims=True)             # (tile_n, 1)
        s_row = jnp.sum(s_sc[...] * jnp.exp(m_lane - m_row),
                        axis=-1, keepdims=True)                     # (tile_n, 1)
        lse = m_row + jnp.log(s_row + jnp.exp(p - m_row))
        out_ref[...] = lse - p        # cross-entropy with label 0 (the positive)


def densecl_contrastive_head(pos, neg, temperature=0.1, *,
                             tile_n=128, tile_k=8192):
    """JAX/Pallas equivalent of DenseCLContrastiveHead.forward."""
    assert pos.ndim == 2 and pos.shape[1] == 1
    assert neg.ndim == 2 and neg.shape[0] == pos.shape[0]
    n, k = neg.shape

    row_align = _row_align(pos.dtype, neg.dtype)

    # Row tile: clamp to the problem, round to the dtype sublane packing, and
    # prefer >= 2 row tiles so the v7x second TensorCore gets work.
    tile_n = min(tile_n, _round_up(n, row_align))
    tile_n = _round_up(tile_n, row_align)
    tile_n = min(tile_n, _round_up(-(-n // 2), row_align))

    # K tile: lane aligned, clamped to the problem (no wrapper padding).
    tile_k = min(tile_k, _round_up(k, _LANES))
    tile_k = _round_up(tile_k, _LANES)

    grid = (pl.cdiv(n, tile_n), pl.cdiv(k, tile_k))
    need_k_mask = (k % tile_k) != 0      # ragged last K tile -> mask in-kernel

    kernel = functools.partial(
        _densecl_head_kernel,
        inv_temperature=1.0 / float(temperature),
        tile_n=tile_n, tile_k=tile_k, real_k=k, need_k_mask=need_k_mask)

    bytes_in = pos.size * pos.dtype.itemsize + neg.size * neg.dtype.itemsize
    cost = pl.CostEstimate(flops=4 * n * k,
                           transcendentals=n * k,
                           bytes_accessed=bytes_in + n * 4)

    per_row = pl.pallas_call(
        kernel,
        out_shape=jax.ShapeDtypeStruct((n, 1), jnp.float32),
        grid_spec=pltpu.PrefetchScalarGridSpec(
            num_scalar_prefetch=0,
            grid=grid,
            in_specs=[
                pl.BlockSpec((tile_n, 1), lambda i, j: (i, 0)),       # pos
                pl.BlockSpec((tile_n, tile_k), lambda i, j: (i, j)),  # neg
            ],
            out_specs=pl.BlockSpec((tile_n, 1), lambda i, j: (i, 0)),
            scratch_shapes=[
                pltpu.VMEM((tile_n, _LANES), jnp.float32),  # per-lane running max
                pltpu.VMEM((tile_n, _LANES), jnp.float32),  # per-lane exp-sum
            ],
        ),
        compiler_params=pltpu.CompilerParams(
            dimension_semantics=("parallel", "arbitrary"),
            vmem_limit_bytes=48 * 1024 * 1024),
        cost_estimate=cost,
    )(pos, neg)   # native dtype in; kernel upcasts to f32 on load

    # Tiny final reduction (mean over the N real rows) in plain JAX.
    loss = jnp.mean(per_row)
    return {"loss_contra": loss}


def _reference(pos, neg, temperature=0.1):
    logits = jnp.concatenate([pos, neg], axis=1).astype(jnp.float32) / temperature
    return -jnp.mean(jax.nn.log_softmax(logits, axis=-1)[:, 0])


if __name__ == "__main__":
    key = jax.random.PRNGKey(0)
    k_pos, k_neg = jax.random.split(key)

    # Small, deliberately non-tile-aligned shapes: exercises ragged N tiles,
    # the in-kernel K mask, and the multi-tile online-logsumexp path.
    N, K = 20, 300
    pos = jax.random.normal(k_pos, (N, 1), dtype=jnp.float32)
    neg = jax.random.normal(k_neg, (N, K), dtype=jnp.float32)

    ref = jax.block_until_ready(_reference(pos, neg, temperature=0.1))

    # 1) Small tiles -> 3x3 grid: ragged N tile + ragged, in-kernel-masked K tile.
    out = densecl_contrastive_head(pos, neg, temperature=0.1,
                                   tile_n=8, tile_k=128)
    loss = jax.block_until_ready(out["loss_contra"])
    assert jnp.allclose(loss, ref, rtol=1e-5, atol=1e-5), (loss, ref)

    # 2) Default (production-sized) tiles, clamped to the small problem.
    out2 = densecl_contrastive_head(pos, neg, temperature=0.1)
    loss2 = jax.block_until_ready(out2["loss_contra"])
    assert jnp.allclose(loss2, ref, rtol=1e-5, atol=1e-5), (loss2, ref)

    # 3) Native bf16 inputs: no wrapper-side cast, f32 math inside the kernel,
    #    16-row sublane alignment for the packed dtype.
    pos_bf = pos.astype(jnp.bfloat16)
    neg_bf = neg.astype(jnp.bfloat16)
    out3 = densecl_contrastive_head(pos_bf, neg_bf, temperature=0.1,
                                    tile_n=16, tile_k=128)
    loss3 = jax.block_until_ready(out3["loss_contra"])
    ref3 = jax.block_until_ready(
        _reference(pos_bf.astype(jnp.float32), neg_bf.astype(jnp.float32), 0.1))
    assert jnp.allclose(loss3, ref3, rtol=1e-4, atol=1e-4), (loss3, ref3)

    # 4) Tile-aligned shapes (no masking path), multi-tile grid on both axes,
    #    non-default temperature.
    N2, K2 = 32, 512
    pos2 = jax.random.normal(k_pos, (N2, 1), dtype=jnp.float32)
    neg2 = jax.random.normal(k_neg, (N2, K2), dtype=jnp.float32)
    ref4 = jax.block_until_ready(_reference(pos2, neg2, temperature=0.2))
    out4 = densecl_contrastive_head(pos2, neg2, temperature=0.2,
                                    tile_n=16, tile_k=256)
    loss4 = jax.block_until_ready(out4["loss_contra"])
    assert jnp.allclose(loss4, ref4, rtol=1e-5, atol=1e-5), (loss4, ref4)

    print("KERNEL_OK")
</pallas_src>

<mosaic_0001>
module attributes {stable_mosaic.version = 11 : i64} {
  func.func @_densecl_head_kernel(%arg0: i32, %arg1: i32, %arg2: memref<8x1xf32, #tpu.memory_space<vmem>>, %arg3: memref<8x128xf32, #tpu.memory_space<vmem>>, %arg4: memref<8x1xf32, #tpu.memory_space<vmem>>, %arg5: memref<8x128xf32, #tpu.memory_space<vmem>>, %arg6: memref<8x128xf32, #tpu.memory_space<vmem>>) attributes {dimension_semantics = [#tpu.dimension_semantics<parallel>, #tpu.dimension_semantics<arbitrary>], iteration_bounds = array<i64: 3, 3>, scalar_prefetch = 0 : i64, scratch_operands = 2 : i64, tpu.core_type = #tpu.core_type<tc>, window_params = [{transform_indices = @transform_0, window_bounds = array<i64: 8, 1>}, {transform_indices = @transform_1, window_bounds = array<i64: 8, 128>}, {transform_indices = @transform_2, window_bounds = array<i64: 8, 1>}]} {
    %c0 = arith.constant 0 : index
    %c0_0 = arith.constant 0 : index
    %0 = vector.load %arg2[%c0, %c0_0] : memref<8x1xf32, #tpu.memory_space<vmem>>, vector<8x1xf32>
    %cst = arith.constant 1.000000e+01 : f32
    %1 = vector.broadcast %cst : f32 to vector<8x1xf32>
    %2 = arith.mulf %0, %1 : vector<8x1xf32>
    %c0_i32 = arith.constant 0 : i32
    %3 = arith.cmpi eq, %arg1, %c0_i32 : i32
    %4 = arith.extui %3 : i1 to i32
    %c0_i32_1 = arith.constant 0 : i32
    %5 = arith.cmpi ne, %4, %c0_i32_1 : i32
    scf.if %5 {
      %42 = vector.shape_cast %2 : vector<8x1xf32> to vector<8x1xf32>
      %43 = vector.broadcast %42 : vector<8x1xf32> to vector<8x128xf32>
      %c0_22 = arith.constant 0 : index
      %c0_23 = arith.constant 0 : index
      %44 = vector.load %arg5[%c0_22, %c0_23] : memref<8x128xf32, #tpu.memory_space<vmem>>, vector<8x128xf32>
      tpu.vector_store %arg5[%c0_22, %c0_23], %43 {strides = array<i32>} : memref<8x128xf32, #tpu.memory_space<vmem>>, vector<8x128xf32>,
      %cst_24 = arith.constant 0.000000e+00 : f32
      %45 = vector.broadcast %cst_24 : f32 to vector<8x128xf32>
      %c0_25 = arith.constant 0 : index
      %c0_26 = arith.constant 0 : index
      %46 = vector.load %arg6[%c0_25, %c0_26] : memref<8x128xf32, #tpu.memory_space<vmem>>, vector<8x128xf32>
      tpu.vector_store %arg6[%c0_25, %c0_26], %45 {strides = array<i32>} : memref<8x128xf32, #tpu.memory_space<vmem>>, vector<8x128xf32>,
    } else {
    }
    %6 = tpu.iota {dimensions = array<i32: 1>} : vector<8x128xi32>
    %c128_i32 = arith.constant 128 : i32
    %7 = arith.muli %arg1, %c128_i32 : i32
    %8 = vector.broadcast %7 : i32 to vector<8x128xi32>
    %9 = arith.addi %6, %8 : vector<8x128xi32>
    %c0_2 = arith.constant 0 : index
    %c0_3 = arith.constant 0 : index
    %10 = vector.load %arg3[%c0_2, %c0_3] : memref<8x128xf32, #tpu.memory_space<vmem>>, vector<8x128xf32>
    %cst_4 = arith.constant 1.000000e+01 : f32
    %11 = vector.broadcast %cst_4 : f32 to vector<8x128xf32>
    %12 = arith.mulf %10, %11 : vector<8x128xf32>
    %c0_i32_5 = arith.constant 0 : i32
    %13 = vector.broadcast %c0_i32_5 : i32 to vector<8x128xi32>
    %14 = arith.addi %9, %13 : vector<8x128xi32>
    %c300_i32 = arith.constant 300 : i32
    %15 = vector.broadcast %c300_i32 : i32 to vector<8x128xi32>
    %16 = arith.cmpi slt, %14, %15 : vector<8x128xi32>
    %cst_6 = arith.constant -1.000000e+30 : f32
    %17 = vector.broadcast %cst_6 : f32 to vector<8x128xf32>
    %18 = arith.select %16, %12, %17 : vector<8x128xi1>, vector<8x128xf32>
    %c0_7 = arith.constant 0 : index
    %c0_8 = arith.constant 0 : index
    %19 = vector.load %arg5[%c0_7, %c0_8] : memref<8x128xf32, #tpu.memory_space<vmem>>, vector<8x128xf32>
    %20 = arith.maximumf %19, %18 : vector<8x128xf32>
    %21 = arith.subf %19, %20 : vector<8x128xf32>
    %22 = math.exp %21 : vector<8x128xf32>
    %c0_9 = arith.constant 0 : index
    %c0_10 = arith.constant 0 : index
    %23 = vector.load %arg3[%c0_9, %c0_10] : memref<8x128xf32, #tpu.memory_space<vmem>>, vector<8x128xf32>
    %cst_11 = arith.constant 1.000000e+01 : f32
    %24 = vector.broadcast %cst_11 : f32 to vector<8x128xf32>
    %25 = arith.mulf %23, %24 : vector<8x128xf32>
    %c0_i32_12 = arith.constant 0 : i32
    %26 = vector.broadcast %c0_i32_12 : i32 to vector<8x128xi32>
    %27 = arith.addi %9, %26 : vector<8x128xi32>
    %c300_i32_13 = arith.constant 300 : i32
    %28 = vector.broadcast %c300_i32_13 : i32 to vector<8x128xi32>
    %29 = arith.cmpi slt, %27, %28 : vector<8x128xi32>
    %cst_14 = arith.constant -1.000000e+30 : f32
    %30 = vector.broadcast %cst_14 : f32 to vector<8x128xf32>
    %31 = arith.select %29, %25, %30 : vector<8x128xi1>, vector<8x128xf32>
    %32 = arith.subf %31, %20 : vector<8x128xf32>
    %33 = math.exp %32 : vector<8x128xf32>
    %c0_15 = arith.constant 0 : index
    %c0_16 = arith.constant 0 : index
    %34 = vector.load %arg6[%c0_15, %c0_16] : memref<8x128xf32, #tpu.memory_space<vmem>>, vector<8x128xf32>
    %35 = arith.mulf %34, %22 : vector<8x128xf32>
    %36 = arith.addf %35, %33 : vector<8x128xf32>
    %c0_17 = arith.constant 0 : index
    %c0_18 = arith.constant 0 : index
    %37 = vector.load %arg6[%c0_17, %c0_18] : memref<8x128xf32, #tpu.memory_space<vmem>>, vector<8x128xf32>
    tpu.vector_store %arg6[%c0_17, %c0_18], %36 {strides = array<i32>} : memref<8x128xf32, #tpu.memory_space<vmem>>, vector<8x128xf32>,
    %c0_19 = arith.constant 0 : index
    %c0_20 = arith.constant 0 : index
    %38 = vector.load %arg5[%c0_19, %c0_20] : memref<8x128xf32, #tpu.memory_space<vmem>>, vector<8x128xf32>
    tpu.vector_store %arg5[%c0_19, %c0_20], %20 {strides = array<i32>} : memref<8x128xf32, #tpu.memory_space<vmem>>, vector<8x128xf32>,
    %c2_i32 = arith.constant 2 : i32
    %39 = arith.cmpi eq, %arg1, %c2_i32 : i32
    %40 = arith.extui %39 : i1 to i32
    %c0_i32_21 = arith.constant 0 : i32
    %41 = arith.cmpi ne, %40, %c0_i32_21 : i32
    scf.if %41 {
      %c0_22 = arith.constant 0 : index
      %c0_23 = arith.constant 0 : index
      %42 = vector.load %arg5[%c0_22, %c0_23] : memref<8x128xf32, #tpu.memory_space<vmem>>, vector<8x128xf32>
      %cst_24 = arith.constant dense<0xFF800000> : vector<8xf32>
      %43 = vector.multi_reduction <maximumf>, %42, %cst_24 [1] : vector<8x128xf32> to vector<8xf32>
      %44 = vector.shape_cast %43 : vector<8xf32> to vector<8x1xf32>
      %c0_25 = arith.constant 0 : index
      %c0_26 = arith.constant 0 : index
      %45 = vector.load %arg6[%c0_25, %c0_26] : memref<8x128xf32, #tpu.memory_space<vmem>>, vector<8x128xf32>
      %46 = vector.broadcast %44 : vector<8x1xf32> to vector<8x128xf32>
      %47 = arith.subf %42, %46 : vector<8x128xf32>
      %48 = math.exp %47 : vector<8x128xf32>
      %49 = arith.mulf %45, %48 : vector<8x128xf32>
      %cst_27 = arith.constant dense<0.000000e+00> : vector<8xf32>
      %50 = vector.multi_reduction <add>, %49, %cst_27 [1] : vector<8x128xf32> to vector<8xf32>
      %51 = vector.shape_cast %50 : vector<8xf32> to vector<8x1xf32>
      %52 = arith.subf %2, %44 : vector<8x1xf32>
      %53 = math.exp %52 : vector<8x1xf32>
      %54 = arith.addf %51, %53 : vector<8x1xf32>
      %55 = math.log %54 : vector<8x1xf32>
      %56 = arith.addf %44, %55 : vector<8x1xf32>
      %57 = arith.subf %56, %2 : vector<8x1xf32>
      %c0_28 = arith.constant 0 : index
      %c0_29 = arith.constant 0 : index
      %58 = vector.load %arg4[%c0_28, %c0_29] : memref<8x1xf32, #tpu.memory_space<vmem>>, vector<8x1xf32>
      tpu.vector_store %arg4[%c0_28, %c0_29], %57 {strides = array<i32>} : memref<8x1xf32, #tpu.memory_space<vmem>>, vector<8x1xf32>,
    } else {
    }
    return
  }
  func.func @transform_0(%arg0: i32, %arg1: i32) -> (i32, i32) {
    %c0_i32 = arith.constant 0 : i32
    %c0_i32_0 = arith.constant 0 : i32
    return %arg0, %c0_i32 : i32, i32
  }
  func.func @transform_1(%arg0: i32, %arg1: i32) -> (i32, i32) {
    %c0_i32 = arith.constant 0 : i32
    return %arg0, %arg1 : i32, i32
  }
  func.func @transform_2(%arg0: i32, %arg1: i32) -> (i32, i32) {
    %c0_i32 = arith.constant 0 : i32
    %c0_i32_0 = arith.constant 0 : i32
    return %arg0, %c0_i32 : i32, i32
  }
}

</mosaic_0001>

<bundles_post_ra>
// kernel: tpu_custom_call.1
= control target key start
LH: loop header
LB: loop body
LE: loop exit
PB: predicated region body
PF: predicated region fallthrough
CT: control target
= control target key end

     0   :  { %7 = vsyncpa [#allocation5], 0  ;;  %s716_s0 = inlined_call_operand.vmem [shape: f32[20,1], index: 0, kind: input, shape index: {}]   ;;  %s717_s1 = inlined_call_operand.hbm [shape: f32[20,300], index: 1, kind: input, shape index: {}]   ;;  %s718_s2 = inlined_call_operand.vmem [shape: f32[20,1], index: 2, kind: output, shape index: {}]  }
   0x1   :  { %9 = vsyncpa [#allocation5 + $0x1], 0  ;;  %s557_s9 = smov 0   ;;  %s559_s10 = smov 0  }
   0x2   :  { %s561_s11 = smov 0   ;;  %s563_s12 = smov 0  }
   0x3   :  { %s565_s13 = smov 0   ;;  %s567_s14 = smov 0  }
   0x4   :  { %s569_s15 = smov 0   ;;  %s571_s16 = smov 0  }
   0x5 LB: > { %s341_s17 = sadd.s32 4294967295, %s537_s16   ;;  %s24_s18 = sadd.s32 1, %s529_s14  ;;  %s537_s16 = sphi %s571_s16, %s15_s16   ;;  %s533_s15 = sphi %s569_s15, %s730_s15   ;;  %s529_s14 = sphi %s567_s14, %s729_s14   ;;  %s525_s13 = sphi %s565_s13, %s728_s13   ;;  %s521_s12 = sphi %s563_s12, %s727_s12   ;;  %s517_s11 = sphi %s561_s11, %s726_s11   ;;  %s513_s10 = sphi %s559_s10, %s725_s10   ;;  %s509_s9 = sphi %s557_s9, %s724_s9  }
   0x6   : > { %p25_p0 = scmp.ge.s32.totalorder %s24_s18, 3  ;;  %s27_s19 = sadd.s32 1, %s533_s15 }
   0x7   : > { %s62_s20 = sadd.s32 1, %s517_s11  ;;  %p69_p1 = scmp.ne.s32.totalorder %s517_s11, %s513_s10 }
   0x8   : > { %s732_s18 = smov (%p25_p0, %s24_s18), 0  ;;  %s734_s19 = smov (!%p25_p0, %s27_s19), %s533_s15 }
   0x9   : > { %s58_s21 = ssub.s32 %s529_s14, %s732_s18  ;;  %p70_p2 = scmp.eq.s32.totalorder %s537_s16, 0 }
   0xa   : > { %p29_p3 = scmp.ge.s32.totalorder %s734_s19, 3  ;;  %p75_p4 = scmp.ne.s32.totalorder %s513_s10, %s509_s9 }
   0xb   : > { %p608_p5 = por %p70_p2, %p69_p1  ;;  %p76_p6 = scmp.eq.s32.totalorder %s341_s17, 0 }
   0xc   : > { %s736_s19 = smov (%p29_p3, %s734_s19), 0  ;;  %p363_p8 = scmp.lt.s32.totalorder %s537_s16, 9 }
   0xd   : > { %p614_p7 = por %p76_p6, %p75_p4  ;;  %s57_s24 = ssub.s32 %s533_s15, %s736_s19 }
   0xe   : > { %s59_s25 = sor.u32 %s58_s21, %s57_s24  ;;  %s132_s26 = sand.u32 1, %s517_s11  }
   0xf   : > { %p60_p9 = scmp.eq.s32.totalorder %s59_s25, 0  ;;  %s345_s27 = sshll.u32 %s132_s26, 3 }
  0x10   : > { %s356_s28 = smul.u32 3, %s533_s15  ;;  %s136_s4 = scalar_lea.vmem [#allocation4], %s345_s27 }
  0x11   : > { %s624_s29 = scalar_select %p60_p9, %s517_s11, %s62_s20  }
  0x12   : > { %s141_s30 = sadd.s32 %s529_s14, %s356_s28  ;;  %s145_s5 = sshll.u32 %s136_s4, 4  ;;  %s632_s5 = int_to_ptr.vmem [resolvable:$true] %s145_s5 }
  0x13   : > { %s346_s3 = sshll.u32 %s141_s30, 7  ;;  %p638_p10 = pnand %p363_p8, %p608_p5 }
  0x14   : > { %s630_s8 = scalar_lea.hbm %s717_s1, %s346_s3  ;;  %s133_s17 = scalar_lea.sflag [#allocation5], %s132_s26 }
  0x15   : > { %s441_s20 = scalar_lea.hbm %s630_s8, 128  ;;  %p443_p0 = pneg %p638_p10 }
  0x16   : > { %p442_p13 = scmp.ne.s32.totalorder %s630_s8, %s441_s20  ;;  %s446_s24 = scalar_lea.hbm %s717_s1, 1152 }
  0x17   : > { %p447_p3 = scmp.lt.u32.totalorder %s630_s8, %s717_s1  ;;  %p448_p4 = scmp.lt.u32.totalorder %s446_s24, %s441_s20 }
  0x18   : > { %p444_p1 = pnand %p443_p0, %p442_p13  ;;  %p450_p6 = scmp.lt.u32.totalorder %s441_s20, %s630_s8 }
  0x19   : > { %p449_p5 = por %p448_p4, %p447_p3 }
  0x1a   : > { %p445_p2 = pneg %p444_p1 }
  0x1b   : > { %p451_p8 = por %p450_p6, %p449_p5 }
  0x1d   : > { %p452_p9 = pnand %p451_p8, %p445_p2 }
  0x1f   : > { %455 = shalt.err (!%p452_p9)
}
  0x20   : > { %s456_s26 = scalar_lea.vmem %s632_s5, 128  ;;  %s539_s28 = smov [#allocation4]  }
  0x21   : > { %p457_p13 = scmp.ne.s32.totalorder %s632_s5, %s456_s26  ;;  %s461_s30 = sshll.u32 %s539_s28, 4  ;;  %s462_s30 = int_to_ptr.vmem [resolvable:$false] %s461_s30 }
  0x22   : > { %s463_s3 = scalar_lea.vmem %s462_s30, 256  ;;  %p464_p12 = scmp.lt.s32.totalorder %s632_s5, %s462_s30 }
  0x23   : > { %p459_p1 = pnand %p457_p13, %p443_p0  ;;  %p465_p3 = scmp.lt.s32.totalorder %s463_s3, %s456_s26 }
  0x25   : > { %p460_p11 = pneg %p459_p1  ;;  %p466_p4 = por %p465_p3, %p464_p12 }
  0x27   : > { %p467_p5 = pnand %p466_p4, %p460_p11 }
  0x29   : > { %470 = shalt.err (!%p467_p5)
}
  0x2a   : > { %362 = dma.hbm_to_vmem [thread:$0]  (!%p638_p10), %s630_s8, 128, %s632_s5, %s133_s17  }
  0x2b   : > { %p722_p2 = scmp.lt.s32.totalorder %s537_s16, 10  ;;  %p723_p6 = scmp.ge.s32.totalorder %s537_s16, 1 }
  0x2d   : > { %p151_p0 = pnand %p723_p6, %p722_p2 }
  0x2e   : > { %s156_s4 = sand.u32 (!%p151_p0), 1, %s513_s10  }
  0x2f   : > { %154 = sbr.rel (%p151_p0) target bundleno = 531 (0x213), region = 28  ;;  %s348_s6 = sshll.u32 (!%p151_p0), %s156_s4, 3 }
  0x30   : > { %s157_s7 = scalar_lea.sflag (!%p151_p0), [#allocation5], %s156_s4  ;;  %s160_s20 = scalar_lea.vmem (!%p151_p0), [#allocation4], %s348_s6 }
  0x36   : > { %504 = dma.done.wait (%p614_p7), %s157_s7, 128  }
  0x37   : > { %506 = vsyncadd (%p614_p7), %s157_s7, 4294967168  ;;  %p184_p11 = scmp.lt.s32.totalorder %s525_s13, 2  ;;  %p351_p10 = scmp.ne.s32.totalorder %s521_s12, 0 }
  0x38   : > { %v540_v2 = vmov (!%p351_p10), 0   ;;  %v541_v3 = vmov (!%p351_p10), 0.0  }
  0x39   : > { %s738_s13 = smov (!%p184_p11, %s525_s13), 2  ;;  %197 = sbr.rel (%p351_p10) target bundleno = 192 (0xc0), region = 36 }
  0x3a   : > { %s349_s5 = sshll.u32 %s738_s13, 3  ;;  %430 = vset.pattern.permute.xlu0 (!%p351_p10), %v540_v2  ;;  %204 = vst [vmem:[#allocation3] sm:$0xff] (!%p351_p10), %v541_v3 }
  0x3b   : > { %s187_s17 = scalar_lea.vmem %s716_s0, %s349_s5  ;;  %s686_s24 = scalar_lea.vmem %s718_s2, %s349_s5 }
  0x3c   : > { %v192_v0 = vld [vmem:[%s187_s17] sm:$0xff] }
  0x3d   : > { %v193_v1 = vmul.f32 10.0, %v192_v0 }
  0x3f   : > { %200 = vperm.xlu0 (!%p351_p10), %430, %v193_v1  }
  0xbe   : > { %v201_v4 = vpop.permute.xlu0 %200 }
  0xbf   : > { %203 = vst [vmem:[#allocation2] sm:$0xff] %v201_v4 }
  0xc0 PF: > { %v205_v5 = vlaneseq  ;;  %s352_s13 = sshll.u32 %s521_s12, 7  ;;  %v210_v6 = vld [vmem:[%s160_s20] sm:$0xff]  ;;  %p353_p7 = scmp.ne.s32.totalorder %s521_s12, 2 }
  0xc1   : > { %v208_v7 = vstv %s352_s13  ;;  %v211_v9 = vmul.f32 10.0, %v210_v6  ;;  %v222_v18 = vld [vmem:[#allocation3] sm:$0xff]  ;;  %vm249_vm1 = vcmask (!%p353_p7), 7168  }
  0xc2   : > { %v206_v8 = vand.u32 127, %v205_v5 }
  0xc4   : > { %v209_v10 = vadd.s32 %v208_v7, %v206_v8 }
  0xc6   : > { %v214_v11 = vld [vmem:[#allocation2] sm:$0xff]  ;;  %vm212_vm0 = vcmp.lt.s32.totalorder %v209_v10, 300 }
  0xc7   : > { %v213_v12 = vsel %vm212_vm0, %v211_v9, -1e+30 }
  0xc8   : > { %v215_v13 = vmax.f32 %v214_v11, %v213_v12 }
  0xca   : > { %v216_v14 = vsub.f32 %v214_v11, %v215_v13  ;;  %v219_v15 = vsub.f32 %v213_v12, %v215_v13  ;;  %226 = vst [vmem:[#allocation2] sm:$0xff] %v215_v13 }
  0xcc   : > { %v217_v16 = vmul.f32 1.442695, %v216_v14  ;;  %v220_v17 = vmul.f32 1.442695, %v219_v15 }
  0xce   : > { %431 = vpow2.f32 %v217_v16 }
  0xcf   : > { %433 = vpow2.f32 %v220_v17 }
  0xd1   : > { %v231_v23 = vld [vmem:[#allocation2] sm:$0xff] (!%p353_p7) }
  0xd2   : > { %232 = vmax.xlane.f32.xlu0 (!%p353_p7), %v231_v23 }
  0xd7   : > { %230 = sbr.rel (%p353_p7) target bundleno = 531 (0x213), region = 40 }
  0xd8   : > { %v432_v19 = vpop.eup %431 }
  0xd9   : > { %v434_v20 = vpop.eup %433  ;;  %v223_v21 = vmul.f32 %v432_v19, %v222_v18 }
  0xdb   : > { %v224_v22 = vadd.f32 %v434_v20, %v223_v21 }
  0xdd   : > { %225 = vst [vmem:[#allocation3] sm:$0xff] %v224_v22 }
  0xe4   : > { %v234_v27 = vld [vmem:[#allocation3] sm:$0xff] }
 0x15f   : > { %v233_v24 = vpop.xlane.xlu0 %232 }
 0x160   : > { %v235_v25 = vsub.f32 %v231_v23, %v233_v24  ;;  %v241_v30 = vsub.f32 %v193_v1, %v233_v24 }
 0x162   : > { %v236_v26 = vmul.f32 1.442695, %v235_v25  ;;  %v242_v31 = vmul.f32 1.442695, %v241_v30 }
 0x164   : > { %435 = vpow2.f32 %v236_v26 }
 0x165   : > { %437 = vpow2.f32 %v242_v31 }
 0x16e   : > { %v436_v28 = vpop.eup %435 }
 0x16f   : > { %v238_v29 = vmul.f32 %v436_v28, %v234_v27  ;;  %v438_v32 = vpop.eup %437 }
 0x171   : > { %239 = vadd.xlane.f32.xlu0 %v238_v29 }
 0x1fe   : > { %v240_v33 = vpop.xlane.xlu0 %239 }
 0x1ff   : > { %v244_v34 = vadd.f32 %v438_v32, %v240_v33 }
 0x201   : > { %439 = vlog2.f32 %v244_v34 }
 0x20b   : > { %v440_v35 = vpop.eup %439 }
 0x20c   : > { %v246_v36 = vmul.f32 0.6931472, %v440_v35 }
 0x20e   : > { %v247_v37 = vadd.f32 %v246_v36, %v233_v24 }
 0x210   : > { %v248_v38 = vsub.f32 %v247_v37, %v193_v1 }
 0x212   : > { %250 = vst.msk [vmem:[%s686_s24] sm:$0xff] %vm249_vm1, %v248_v38 }
 0x213 PF: > { %s15_s16 = sadd.s32 1, %s537_s16   ;;  %s724_s9 = smov %s513_s10 }
 0x214   : > { %p12_p12 = scmp.ge.s32.totalorder %s15_s16, 11   ;;  %s725_s10 = smov %s517_s11 }
 0x215   : > { %s726_s11 = smov %s624_s29  ;;  %s727_s12 = smov %s529_s14 }
 0x216   : > { %s728_s13 = smov %s533_s15  ;;  %s729_s14 = smov %s732_s18 }
 0x217   : > { %s730_s15 = smov %s736_s19  ;;  %14 = sbr.rel (!%p12_p12) target bundleno = 5 (0x5), region = 79 }
 0x21e   :  { %270 = vsyncpa [#allocation5], 1 }
 0x21f   :  { %272 = vsyncpa [#allocation5 + $0x1], 1 }

</bundles_post_ra>
